<compile_context>
chip_gen: v5e
topology: v5e:2x2
jax: 0.10.0
libtpu: 0.0.40
codegen_flags: <defaults>
</compile_context>

<pallas_src>
import jax
import jax.numpy as jnp
from jax.experimental import pallas as pl
from jax.experimental.pallas import tpu as pltpu


def _round_up(x, m):
    return (x + m - 1) // m * m


def _regressor_kernel(x_ref, wp_ref, bp_ref, wbd_ref, bc_ref, out_ref, acc_ref):
    """One grid step == (goal block j, K slab k).

    x_ref  : (Bp, tk)   bf16  shared cls hidden state, K slab k
    wp_ref : (tk, Ngt)  bf16  pre-transposed pooling weights, goals on lanes
    bp_ref : (1, Ngt)   f32   pooling biases
    wbd_ref: (Ngt, gt)  f32   block-diagonal classifier weights
    bc_ref : (1, gt)    f32   classifier biases
    out_ref: (Bp, gt)   f32   predictions for goal block j (batch-major)
    acc_ref: (Bp, Ngt)  f32   pooling pre-activation accumulator (scratch)
    """
    k = pl.program_id(1)

    @pl.when(k == 0)
    def _():
        acc_ref[...] = jnp.zeros_like(acc_ref)

    # Pooling matmul: bf16 operands, f32 accumulation on the MXU.
    acc_ref[...] += jnp.dot(x_ref[...], wp_ref[...],
                            preferred_element_type=jnp.float32)

    @pl.when(k == pl.num_programs(1) - 1)
    def _():
        pooled = jnp.tanh(acc_ref[...] + bp_ref[...])        # (Bp, Ngt) f32
        # Dropout is identity in eval/inference mode.
        # Classifier: one block-diagonal MXU matmul (no relayout / XLU reduce).
        out_ref[...] = (
            jnp.dot(pooled, wbd_ref[...], preferred_element_type=jnp.float32)
            + bc_ref[...]
        )


def _vmem_budgets():
    """Generation-aware VMEM budgets derived from the actual chip."""
    try:
        cap = int(getattr(pltpu.get_tpu_info(), "vmem_capacity_bytes", 64 << 20))
    except Exception:
        cap = 64 << 20  # conservative fallback (v7x per-TC VMEM)
    # Never request all of physical VMEM: leave headroom for compiler scratch
    # (v7x: 48 of 64 MiB; v5e/v6e: 96 of 128 MiB).
    scoped_limit = min((cap * 3) // 4, 96 << 20)
    weight_budget = scoped_limit // 2  # budget for the double-buffered W block
    return scoped_limit, weight_budget


def _plan(B, H, G, w_itemsize, weight_budget):
    """Pick goal-block size gt, padded dims, and the K (H_in) tile."""
    Bp = _round_up(B, 8)

    def ngt(g):
        return _round_up(g * H, 128)

    # Goal block: largest divisor of G that (a) leaves >= 2 grid blocks (DMA
    # pipelining + both v7x TensorCores) and (b) admits a reasonable K tile
    # inside the double-buffered weight budget.
    gt = 1
    for d in range(G, 0, -1):
        if G % d:
            continue
        if G > 1 and G // d < 2:
            continue
        if 2 * min(H, 512) * ngt(d) * w_itemsize <= weight_budget:
            gt = d
            break
    Ngt = ngt(gt)
    n_blocks = G // gt

    # K (H_in) tiling so BERT-scale H never exceeds the VMEM budget.
    if 2 * _round_up(H, 8) * Ngt * w_itemsize <= weight_budget:
        tk, Hp, n_k = H, H, 1                     # single full-extent K block
    else:
        tk = max(128, (weight_budget // (2 * Ngt * w_itemsize)) // 128 * 128)
        Hp = _round_up(H, tk)
        n_k = Hp // tk
    return Bp, Hp, Ngt, gt, n_blocks, tk, n_k


def regressor_forward(x, w_pool, b_pool, w_cls, b_cls):
    """x: [B, H]; w_pool: [G, H, H] (PyTorch [out, in]); b_pool: [G, H];
    w_cls: [G, H]; b_cls: [G].  Returns [B, G] goal predictions."""
    B, H = x.shape
    G = w_pool.shape[0]
    w_dtype = jnp.bfloat16                        # streamed weight/act dtype
    wbyte = jnp.dtype(w_dtype).itemsize
    f32b = jnp.dtype(jnp.float32).itemsize

    scoped_limit, weight_budget = _vmem_budgets()
    Bp, Hp, Ngt, gt, n_blocks, tk, n_k = _plan(B, H, G, wbyte, weight_budget)

    # ---- one-time wrapper-side layout prep (no in-kernel transposes) --------
    # w_big[j, h_in, t*H + h_out] = w_pool[j*gt + t, h_out, h_in], padded to
    # (Hp, Ngt) with zeros (zero rows/cols contribute nothing), cast to bf16.
    w_big = (jnp.transpose(w_pool, (2, 0, 1))     # (H_in, G, H_out)
             .reshape(H, n_blocks, gt * H)
             .transpose(1, 0, 2))                 # (n_blocks, H_in, gt*H_out)
    w_big = jnp.pad(w_big, ((0, 0), (0, Hp - H), (0, Ngt - gt * H)))
    w_big = w_big.astype(w_dtype)

    bp = jnp.pad(b_pool.reshape(n_blocks, 1, gt * H),
                 ((0, 0), (0, 0), (0, Ngt - gt * H)))            # f32

    # Block-diagonal classifier: W_bd[j, t*H + h, t] = w_cls[j*gt + t, h].
    eye = jnp.eye(gt, dtype=w_cls.dtype)
    w_bd = (w_cls.reshape(n_blocks, gt, H)[:, :, :, None] * eye[:, None, :])
    w_bd = w_bd.reshape(n_blocks, gt * H, gt)
    w_bd = jnp.pad(w_bd, ((0, 0), (0, Ngt - gt * H), (0, 0)))    # f32

    bc = b_cls.reshape(n_blocks, 1, gt)                          # f32

    x_p = jnp.pad(x, ((0, Bp - B), (0, Hp - H))).astype(w_dtype)

    # ---- VMEM accounting (double-buffered blocks + scratch + headroom) ------
    footprint = (2 * Bp * tk * wbyte          # x block
                 + 2 * tk * Ngt * wbyte       # pooling-weight block
                 + 2 * Ngt * f32b             # pooling bias
                 + 2 * Ngt * gt * f32b        # block-diag classifier
                 + 2 * gt * f32b              # classifier bias
                 + 2 * Bp * gt * f32b         # output block
                 + Bp * Ngt * f32b)           # accumulator scratch
    vmem_limit = int(min(scoped_limit, max(32 << 20, footprint + (8 << 20))))

    out3 = pl.pallas_call(
        _regressor_kernel,
        out_shape=jax.ShapeDtypeStruct((n_blocks, Bp, gt), jnp.float32),
        grid_spec=pltpu.PrefetchScalarGridSpec(
            num_scalar_prefetch=0,
            grid=(n_blocks, n_k),             # goal blocks outer, K inner
            in_specs=[
                pl.BlockSpec((Bp, tk), lambda j, k: (0, k)),                      # x
                pl.BlockSpec((pl.Squeezed(), tk, Ngt), lambda j, k: (j, k, 0)),   # W_pool
                pl.BlockSpec((pl.Squeezed(), 1, Ngt), lambda j, k: (j, 0, 0)),    # b_pool
                pl.BlockSpec((pl.Squeezed(), Ngt, gt), lambda j, k: (j, 0, 0)),   # W_bd
                pl.BlockSpec((pl.Squeezed(), 1, gt), lambda j, k: (j, 0, 0)),     # b_cls
            ],
            out_specs=pl.BlockSpec((pl.Squeezed(), Bp, gt), lambda j, k: (j, 0, 0)),
            scratch_shapes=[pltpu.VMEM((Bp, Ngt), jnp.float32)],
        ),
        compiler_params=pltpu.CompilerParams(
            dimension_semantics=("parallel", "arbitrary"),
            vmem_limit_bytes=vmem_limit,
        ),
    )(x_p, w_big, bp, w_bd, bc)

    # (n_blocks, Bp, gt) -> (B, G): permute tiny goal columns + drop batch pad.
    return out3.transpose(1, 0, 2).reshape(Bp, G)[:B]


def regressor_reference(x, w_pool, b_pool, w_cls, b_cls):
    """Pure-JAX f32 reference mirroring the PyTorch forward (eval mode)."""
    cols = []
    for g in range(w_pool.shape[0]):
        pooled = jnp.tanh(x @ w_pool[g].T + b_pool[g])
        cols.append(pooled @ w_cls[g].T[:, None] + b_cls[g])
    return jnp.concatenate(cols, axis=1)


if __name__ == "__main__":
    B = 2            # batch
    H = 32           # enc_hid_dim
    G = 4            # num_goals

    key = jax.random.PRNGKey(0)
    kx, kwp, kbp, kwc, kbc = jax.random.split(key, 5)

    bound = 1.0 / jnp.sqrt(jnp.float32(H))
    x = jax.random.normal(kx, (B, H), dtype=jnp.float32)
    w_pool = jax.random.uniform(kwp, (G, H, H), jnp.float32, -bound, bound)
    b_pool = jax.random.uniform(kbp, (G, H), jnp.float32, -bound, bound)
    w_cls = jax.random.uniform(kwc, (G, H), jnp.float32, -bound, bound)
    b_cls = jax.random.uniform(kbc, (G,), jnp.float32, -bound, bound)

    out = regressor_forward(x, w_pool, b_pool, w_cls, b_cls)
    out = jax.block_until_ready(out)

    ref = regressor_reference(x, w_pool, b_pool, w_cls, b_cls)
    assert out.shape == (B, G), out.shape
    # Tolerance relaxed vs. the f32 reference because weights/activations are
    # streamed as bf16 (accumulation stays f32).
    assert jnp.allclose(out, ref, atol=3e-2, rtol=3e-2), (out, ref)

    print("KERNEL_OK")
</pallas_src>

<mosaic_0001>
module attributes {stable_mosaic.version = 11 : i64} {
  func.func @_regressor_kernel(%arg0: i32, %arg1: i32, %arg2: memref<8x32xbf16, #tpu.memory_space<vmem>>, %arg3: memref<1x32x128xbf16, #tpu.memory_space<vmem>>, %arg4: memref<1x1x128xf32, #tpu.memory_space<vmem>>, %arg5: memref<1x128x2xf32, #tpu.memory_space<vmem>>, %arg6: memref<1x1x2xf32, #tpu.memory_space<vmem>>, %arg7: memref<1x8x2xf32, #tpu.memory_space<vmem>>, %arg8: memref<8x128xf32, #tpu.memory_space<vmem>>) attributes {dimension_semantics = [#tpu.dimension_semantics<parallel>, #tpu.dimension_semantics<arbitrary>], iteration_bounds = array<i64: 2, 1>, scalar_prefetch = 0 : i64, scratch_operands = 1 : i64, tpu.core_type = #tpu.core_type<tc>, window_params = [{transform_indices = @transform_0, window_bounds = array<i64: 8, 32>}, {transform_indices = @transform_1, window_bounds = array<i64: 1, 32, 128>}, {transform_indices = @transform_2, window_bounds = array<i64: 1, 1, 128>}, {transform_indices = @transform_3, window_bounds = array<i64: 1, 128, 2>}, {transform_indices = @transform_4, window_bounds = array<i64: 1, 1, 2>}, {transform_indices = @transform_5, window_bounds = array<i64: 1, 8, 2>}]} {
    %c0_i32 = arith.constant 0 : i32
    %0 = arith.cmpi eq, %arg1, %c0_i32 : i32
    %1 = arith.extui %0 : i1 to i32
    %c0_i32_0 = arith.constant 0 : i32
    %2 = arith.cmpi ne, %1, %c0_i32_0 : i32
    scf.if %2 {
      %cst_11 = arith.constant 0.000000e+00 : f32
      %13 = vector.broadcast %cst_11 : f32 to vector<8x128xf32>
      %c0_12 = arith.constant 0 : index
      %c0_13 = arith.constant 0 : index
      %14 = vector.load %arg8[%c0_12, %c0_13] : memref<8x128xf32, #tpu.memory_space<vmem>>, vector<8x128xf32>
      tpu.vector_store %arg8[%c0_12, %c0_13], %13 {strides = array<i32>} : memref<8x128xf32, #tpu.memory_space<vmem>>, vector<8x128xf32>,
    } else {
    }
    %c0 = arith.constant 0 : index
    %c0_1 = arith.constant 0 : index
    %3 = vector.load %arg8[%c0, %c0_1] : memref<8x128xf32, #tpu.memory_space<vmem>>, vector<8x128xf32>
    %c0_2 = arith.constant 0 : index
    %c0_3 = arith.constant 0 : index
    %4 = vector.load %arg2[%c0_2, %c0_3] : memref<8x32xbf16, #tpu.memory_space<vmem>>, vector<8x32xbf16>
    %c0_4 = arith.constant 0 : index
    %c0_5 = arith.constant 0 : index
    %c0_6 = arith.constant 0 : index
    %5 = vector.load %arg3[%c0_4, %c0_5, %c0_6] : memref<1x32x128xbf16, #tpu.memory_space<vmem>>, vector<1x32x128xbf16>
    %6 = vector.shape_cast %5 : vector<1x32x128xbf16> to vector<32x128xbf16>
    %cst = arith.constant dense<0.000000e+00> : vector<8x128xf32>
    %7 = tpu.matmul %4, %6, %cst {dimension_numbers = #tpu.dot_dimension_numbers<[1], [0], [0], [1], [0, 0, 1, 1], [], []>} : vector<8x32xbf16>, vector<32x128xbf16>, vector<8x128xf32> -> vector<8x128xf32>
    %8 = arith.addf %3, %7 : vector<8x128xf32>
    %c0_7 = arith.constant 0 : index
    %c0_8 = arith.constant 0 : index
    %9 = vector.load %arg8[%c0_7, %c0_8] : memref<8x128xf32, #tpu.memory_space<vmem>>, vector<8x128xf32>
    tpu.vector_store %arg8[%c0_7, %c0_8], %8 {strides = array<i32>} : memref<8x128xf32, #tpu.memory_space<vmem>>, vector<8x128xf32>,
    %c0_i32_9 = arith.constant 0 : i32
    %10 = arith.cmpi eq, %arg1, %c0_i32_9 : i32
    %11 = arith.extui %10 : i1 to i32
    %c0_i32_10 = arith.constant 0 : i32
    %12 = arith.cmpi ne, %11, %c0_i32_10 : i32
    scf.if %12 {
      %c0_11 = arith.constant 0 : index
      %c0_12 = arith.constant 0 : index
      %13 = vector.load %arg8[%c0_11, %c0_12] : memref<8x128xf32, #tpu.memory_space<vmem>>, vector<8x128xf32>
      %c0_13 = arith.constant 0 : index
      %c0_14 = arith.constant 0 : index
      %c0_15 = arith.constant 0 : index
      %14 = vector.load %arg4[%c0_13, %c0_14, %c0_15] : memref<1x1x128xf32, #tpu.memory_space<vmem>>, vector<1x1x128xf32>
      %15 = vector.shape_cast %14 : vector<1x1x128xf32> to vector<1x128xf32>
      %16 = vector.broadcast %15 : vector<1x128xf32> to vector<8x128xf32>
      %17 = arith.addf %13, %16 : vector<8x128xf32>
      %18 = math.tanh %17 : vector<8x128xf32>
      %c0_16 = arith.constant 0 : index
      %c0_17 = arith.constant 0 : index
      %c0_18 = arith.constant 0 : index
      %19 = vector.load %arg5[%c0_16, %c0_17, %c0_18] : memref<1x128x2xf32, #tpu.memory_space<vmem>>, vector<1x128x2xf32>
      %20 = vector.shape_cast %19 : vector<1x128x2xf32> to vector<128x2xf32>
      %cst_19 = arith.constant dense<0.000000e+00> : vector<8x2xf32>
      %21 = tpu.matmul %18, %20, %cst_19 {dimension_numbers = #tpu.dot_dimension_numbers<[1], [0], [0], [1], [0, 0, 1, 1], [], []>} : vector<8x128xf32>, vector<128x2xf32>, vector<8x2xf32> -> vector<8x2xf32>
      %c0_20 = arith.constant 0 : index
      %c0_21 = arith.constant 0 : index
      %c0_22 = arith.constant 0 : index
      %22 = vector.load %arg6[%c0_20, %c0_21, %c0_22] : memref<1x1x2xf32, #tpu.memory_space<vmem>>, vector<1x1x2xf32>
      %23 = vector.shape_cast %22 : vector<1x1x2xf32> to vector<1x2xf32>
      %24 = vector.broadcast %23 : vector<1x2xf32> to vector<8x2xf32>
      %25 = arith.addf %21, %24 : vector<8x2xf32>
      %c0_23 = arith.constant 0 : index
      %c0_24 = arith.constant 0 : index
      %c0_25 = arith.constant 0 : index
      %26 = vector.load %arg7[%c0_23, %c0_24, %c0_25] : memref<1x8x2xf32, #tpu.memory_space<vmem>>, vector<1x8x2xf32>
      %27 = vector.shape_cast %26 : vector<1x8x2xf32> to vector<8x2xf32>
      %28 = vector.shape_cast %25 : vector<8x2xf32> to vector<1x8x2xf32>
      tpu.vector_store %arg7[%c0_23, %c0_24, %c0_25], %28 {strides = array<i32>} : memref<1x8x2xf32, #tpu.memory_space<vmem>>, vector<1x8x2xf32>,
    } else {
    }
    return
  }
  func.func @transform_0(%arg0: i32, %arg1: i32) -> (i32, i32) {
    %c0_i32 = arith.constant 0 : i32
    %c0_i32_0 = arith.constant 0 : i32
    return %c0_i32, %arg1 : i32, i32
  }
  func.func @transform_1(%arg0: i32, %arg1: i32) -> (i32, i32, i32) {
    %c0_i32 = arith.constant 0 : i32
    %c0_i32_0 = arith.constant 0 : i32
    return %arg0, %arg1, %c0_i32 : i32, i32, i32
  }
  func.func @transform_2(%arg0: i32, %arg1: i32) -> (i32, i32, i32) {
    %c0_i32 = arith.constant 0 : i32
    %c0_i32_0 = arith.constant 0 : i32
    %c0_i32_1 = arith.constant 0 : i32
    return %arg0, %c0_i32, %c0_i32_0 : i32, i32, i32
  }
  func.func @transform_3(%arg0: i32, %arg1: i32) -> (i32, i32, i32) {
    %c0_i32 = arith.constant 0 : i32
    %c0_i32_0 = arith.constant 0 : i32
    %c0_i32_1 = arith.constant 0 : i32
    return %arg0, %c0_i32, %c0_i32_0 : i32, i32, i32
  }
  func.func @transform_4(%arg0: i32, %arg1: i32) -> (i32, i32, i32) {
    %c0_i32 = arith.constant 0 : i32
    %c0_i32_0 = arith.constant 0 : i32
    %c0_i32_1 = arith.constant 0 : i32
    return %arg0, %c0_i32, %c0_i32_0 : i32, i32, i32
  }
  func.func @transform_5(%arg0: i32, %arg1: i32) -> (i32, i32, i32) {
    %c0_i32 = arith.constant 0 : i32
    %c0_i32_0 = arith.constant 0 : i32
    %c0_i32_1 = arith.constant 0 : i32
    return %arg0, %c0_i32, %c0_i32_0 : i32, i32, i32
  }
}

</mosaic_0001>

<bundles_post_ra>
// kernel: tpu_custom_call.1
= control target key start
LH: loop header
LB: loop body
LE: loop exit
PB: predicated region body
PF: predicated region fallthrough
CT: control target
= control target key end

     0   :  { %s632_s18 = smov 0   ;;  %s634_s19 = smov 0   ;;  %s707_s0 = inlined_call_operand.vmem [shape: bf16[8,32], index: 0, kind: input, shape index: {}]   ;;  %s708_s1 = inlined_call_operand.vmem [shape: bf16[2,32,128], index: 1, kind: input, shape index: {}]   ;;  %s709_s2 = inlined_call_operand.vmem [shape: f32[2,1,128], index: 2, kind: input, shape index: {}]   ;;  %s710_s3 = inlined_call_operand.vmem [shape: f32[2,128,2], index: 3, kind: input, shape index: {}]   ;;  %s711_s4 = inlined_call_operand.vmem [shape: f32[2,1,2], index: 4, kind: input, shape index: {}]   ;;  %s712_s5 = inlined_call_operand.vmem [shape: f32[2,8,2], index: 5, kind: output, shape index: {}]  }
   0x1   :  { %s636_s20 = smov 0  }
   0x2 LB: > { %s27_s21 = sadd.s32 1, %s596_s19  ;;  %p529_p0 = scmp.ge.s32.totalorder %s600_s20, 1  ;;  %s600_s20 = sphi %s636_s20, %s15_s20   ;;  %s596_s19 = sphi %s634_s19, %s714_s19   ;;  %s592_s18 = sphi %s632_s18, %s713_s18  }
   0x3   : > { %p29_p1 = scmp.ge.s32.totalorder %s27_s21, 2  ;;  %p241_p2 = scmp.lt.s32.totalorder %s600_s20, 3 }
   0x5   : > { %s716_s21 = smov (%p29_p1, %s27_s21), 0  ;;  %p242_p3 = pnand %p529_p0, %p241_p2 }
   0x6   : > { %p292_p4 = scmp.lt.s32.totalorder (!%p242_p3), %s592_s18, 1 }
   0x7   : > { %245 = sbr.rel (%p242_p3) target bundleno = 287 (0x11f), region = 40 }
   0xc   : > { %s718_s18 = smov (!%p292_p4, %s592_s18), 1  ;;  %v323_v6 = vld [vmem:[%s707_s0] sm:$0xf]  ;;  %vm340_vm0 = vcmask 261120   ;;  %vm409_vm1 = vcmask 15360  }
   0xd   : > { %s546_s22 = sshll.u32 %s718_s18, 4  ;;  %s547_s23 = sshll.u32 %s718_s18, 7 }
   0xe   : > { %s299_s26 = scalar_lea.vmem %s708_s1, %s546_s22  ;;  %s660_s29 = scalar_lea.vmem %s710_s3, %s547_s23 }
   0xf   : > { %v549_v0 = vld [vmem:[%s299_s26 + $0x8] sm:$0xff]  ;;  %v384_v1 = vld [vmem:[%s660_s29 + $0x78] sm:$0xff]  ;;  %v383_v2 = vld [vmem:[%s660_s29 + $0x70] sm:$0xff]  ;;  %s303_s7 = scalar_lea.vmem %s709_s2, %s718_s18  ;;  %s311_s12 = scalar_lea.vmem %s711_s4, %s718_s18 }
  0x10   : > { %389 = vmatpush.msra.mxu1 %v384_v1  ;;  %350 = vmatpush.bf16.msra.mxu0 %v549_v0  ;;  %v548_v3 = vld [vmem:[%s299_s26] sm:$0xff]  ;;  %v382_v4 = vld [vmem:[%s660_s29 + $0x68] sm:$0xff]  ;;  %v380_v7 = vld [vmem:[%s660_s29 + $0x58] sm:$0xff]  ;;  %s534_s15 = sshll.u32 %s718_s18, 3 }
  0x11   : > { %v381_v5 = vld [vmem:[%s660_s29 + $0x60] sm:$0xff]  ;;  %v379_v8 = vld [vmem:[%s660_s29 + $0x50] sm:$0xff]  ;;  %v378_v9 = vld [vmem:[%s660_s29 + $0x48] sm:$0xff]  ;;  %s315_s22 = scalar_lea.vmem %s712_s5, %s534_s15 }
  0x12   : > { %390 = vmatpush.msra.mxu1 %v383_v2  ;;  %v377_v10 = vld [vmem:[%s660_s29 + $0x40] sm:$0xff]  ;;  %v376_v11 = vld [vmem:[%s660_s29 + $0x38] sm:$0xff]  ;;  %v375_v12 = vld [vmem:[%s660_s29 + $0x30] sm:$0xff] }
  0x13   : > { %v374_v13 = vld [vmem:[%s660_s29 + $0x28] sm:$0xff]  ;;  %v373_v14 = vld [vmem:[%s660_s29 + $0x20] sm:$0xff]  ;;  %v372_v15 = vld [vmem:[%s660_s29 + $0x18] sm:$0xff] }
  0x14   : > { %391 = vmatpush.msra.mxu1 %v382_v4  ;;  %351 = vmatpush.bf16.msra.mxu0 %v548_v3  ;;  %v371_v16 = vld [vmem:[%s660_s29 + $0x10] sm:$0xff]  ;;  %v370_v17 = vld [vmem:[%s660_s29 + $0x8] sm:$0xff]  ;;  %v369_v18 = vld [vmem:[%s660_s29] sm:$0xff] }
  0x15   : > { %v574_v19 = vld [vmem:[%s303_s7] ss:$0 sm:$0xff] }
  0x16   : > { %392 = vmatpush.msra.mxu1 %v381_v5  ;;  %v575_v24 = vld [vmem:[%s311_s12] ss:$0 sm:$0xff] }
  0x17   : > { %543 = vmatmul.msk.bf16.vlgmr.msra.gmra.mxu0 %vm340_vm0, %v323_v6 }
  0x18   : > { %393 = vmatpush.msra.mxu1 %v380_v7 }
  0x1a   : > { %394 = vmatpush.msra.mxu1 %v379_v8 }
  0x1c   : > { %395 = vmatpush.msra.mxu1 %v378_v9 }
  0x1e   : > { %396 = vmatpush.msra.mxu1 %v377_v10 }
  0x20   : > { %397 = vmatpush.msra.mxu1 %v376_v11 }
  0x22   : > { %398 = vmatpush.msra.mxu1 %v375_v12 }
  0x24   : > { %399 = vmatpush.msra.mxu1 %v374_v13 }
  0x26   : > { %400 = vmatpush.msra.mxu1 %v373_v14 }
  0x28   : > { %401 = vmatpush.msra.mxu1 %v372_v15 }
  0x2a   : > { %402 = vmatpush.msra.mxu1 %v371_v16 }
  0x2c   : > { %403 = vmatpush.msra.mxu1 %v370_v17 }
  0x2e   : > { %404 = vmatpush.msra.mxu1 %v369_v18 }
  0x94   : > { %v353_v20 = vpop.f32.mrf.mxu0 }
  0x95   : > { %v367_v21 = vadd.f32 %v574_v19, %v353_v20 }
  0x97   : > { %576 = vtanh.f32 %v367_v21 }
  0x9c   : > { %v355_v22 = vpop.f32.mrf.mxu0 }
  0x9d   : > { %v577_v23 = vpop.eup %576 }
  0x9e   : > { %405 = vmatmul.f32.vlgmr.msra.gmra.mxu1 %v577_v23 }
 0x11b   : > { %v406_v25 = vpop.f32.mrf.mxu1 }
 0x11c   : > { %v407_v26 = vadd.f32 %v575_v24, %v406_v25 }
 0x11e   : > { %410 = vst.msk [vmem:[%s315_s22] sm:$0xff] %vm409_vm1, %v407_v26 }
 0x11f PF: > { %s15_s20 = sadd.s32 1, %s600_s20   ;;  %s713_s18 = smov %s596_s19 }
 0x120   : > { %p12_p5 = scmp.ge.s32.totalorder %s15_s20, 4   ;;  %s714_s19 = smov %s716_s21 }
 0x122   :  { %14 = sbr.rel (!%p12_p5) target bundleno = 2 (0x2), region = 90 }

</bundles_post_ra>
